<compile_context>
chip_gen: v7x
topology: tpu7x:2x2x1
jax: 0.10.0
libtpu: 0.0.40
codegen_flags: <defaults>
</compile_context>

<pallas_src>
import functools
import math

import jax
import jax.numpy as jnp
import numpy as np
from jax.experimental import pallas as pl
from jax.experimental.pallas import tpu as pltpu


def _possel_kernel(x_ref, oh_ref, wblk_ref, wlast_ref, bias_ref, out_ref):
    # x_ref    : (TPM, 128) packed activations (P board rows per 128-lane row)
    # oh_ref   : (TPM, Kp)  packed one-hot column, bf16, Kp = max(P, 8)
    # wblk_ref : (128, 128) kron(I_P, W[:, :D].T)            -- resident
    # wlast_ref: (Kp, 128)  kron(I_P, W[:, D] row), zero-pad  -- resident
    # bias_ref : (1, 128)   bias tiled P times                -- resident
    # out_ref  : (TPM, 128) packed output
    acc = jnp.dot(x_ref[...], wblk_ref[...], preferred_element_type=jnp.float32)
    # One-hot-column contribution: tiny K=Kp matmul, accumulated in registers
    # (no read-modify-write of out_ref, no per-batch scalar loop).
    acc = acc + jnp.dot(oh_ref[...].astype(jnp.float32), wlast_ref[...],
                        preferred_element_type=jnp.float32)
    out_ref[...] = (acc + bias_ref[...]).astype(out_ref.dtype)


def prepare_possel_params(W, b):
    """One-time weight prep; hoisted out of the per-call forward path.

    W: (D, D+1) Linear weight, b: (D,) Linear bias.
    Returns (w_blk, w_last, bias_p) ready for position_selection().
    """
    D = W.shape[0]
    assert W.shape == (D, D + 1) and b.shape == (D,)
    if 128 % D != 0:
        # TODO(synk): unpacked fallback path for dims not dividing 128.
        raise NotImplementedError("lane packing requires 128 % dim == 0")
    P = 128 // D
    Kp = max(P, 8)                                              # 8-sublane aligned K
    W1t = jnp.transpose(W[:, :D])                               # (D, D)
    w_blk = jnp.kron(jnp.eye(P, dtype=W.dtype), W1t)            # (128, 128)
    w_last = jnp.kron(jnp.eye(P, dtype=W.dtype), W[:, D][None, :])   # (P, 128)
    if Kp > P:
        w_last = jnp.pad(w_last, ((0, Kp - P), (0, 0)))         # (Kp, 128)
    bias_p = jnp.tile(b, P)[None, :]                            # (1, 128)
    return w_blk, w_last, bias_p


def position_selection(tensors, position, params, *, batches_per_tile=None):
    """tensors: (B, L, D) f32, position: (B,) int, params from prepare_possel_params."""
    w_blk, w_last, bias_p = params
    B, L, D = tensors.shape
    if 128 % D != 0:
        raise NotImplementedError("lane packing requires 128 % dim == 0")
    P = 128 // D                  # board rows packed per 128-lane row
    PD = P * D                    # == 128
    Kp = w_last.shape[0]
    assert w_blk.shape == (PD, PD) and bias_p.shape == (1, PD)
    assert L % P == 0, "board_len must be a multiple of 128 // dim"
    rpb = L // P                  # packed rows per batch
    MP = (B * L) // P             # total packed rows

    # --- Tile-size heuristic (perf review) -------------------------------
    # ~4096 packed rows (~2 MiB in + 2 MiB out per step) amortizes the fixed
    # per-step overhead while staying well inside scoped VMEM everywhere.
    unit = 8 // math.gcd(rpb, 8)          # batches per 8-sublane-aligned tile
    if batches_per_tile is None:
        TB = max(unit, (4096 // rpb) // unit * unit)
        TB = min(TB, B)
        if B > unit and TB >= B:
            # Keep the grid length >= 2: preserves DMA/compute overlap and lets
            # "parallel" shard steps across both v7x TensorCores.
            half = (B + 1) // 2
            TB = max(unit, ((half + unit - 1) // unit) * unit)
    else:
        TB = min(max(1, batches_per_tile), B)
    TPM = TB * rpb                # packed rows per grid step
    assert TPM % 8 == 0 or TPM == MP, "packed tile must be 8-sublane aligned"

    # --- Per-call input prep (zero-cost reshape + tiny one-hot) ----------
    x_packed = tensors.reshape(MP, PD)                            # same bytes
    # Packed one-hot column: (B, L) -> (MP, P); 0/1 is exact in bf16, and this
    # stream is a few percent of the main HBM traffic.
    ohp = jax.nn.one_hot(position, L, dtype=jnp.bfloat16).reshape(MP, P)
    if Kp > P:
        ohp = jnp.pad(ohp, ((0, 0), (0, Kp - P)))                 # (MP, Kp)

    elt = tensors.dtype.itemsize
    grid = (pl.cdiv(B, TB),)

    out_packed = pl.pallas_call(
        _possel_kernel,
        out_shape=jax.ShapeDtypeStruct((MP, PD), tensors.dtype),
        grid_spec=pltpu.PrefetchScalarGridSpec(
            num_scalar_prefetch=0,
            grid=grid,
            in_specs=[
                pl.BlockSpec((TPM, PD), lambda i: (i, 0)),     # activations
                pl.BlockSpec((TPM, Kp), lambda i: (i, 0)),     # packed one-hot
                # Resident operands (constant index maps -> fetched once).
                pl.BlockSpec((PD, PD), lambda i: (0, 0)),      # w_blk
                pl.BlockSpec((Kp, PD), lambda i: (0, 0)),      # w_last
                pl.BlockSpec((1, PD), lambda i: (0, 0)),       # bias
            ],
            out_specs=pl.BlockSpec((TPM, PD), lambda i: (i, 0)),
        ),
        compiler_params=pltpu.CompilerParams(
            dimension_semantics=("parallel",)),
        # Advisory: executed MXU flops and logical streamed bytes.
        cost_estimate=pl.CostEstimate(
            flops=2 * MP * PD * PD + 2 * MP * Kp * PD,
            transcendentals=0,
            bytes_accessed=(2 * MP * PD * elt            # x in + out
                            + MP * Kp * 2                # one-hot (bf16)
                            + (PD * PD + Kp * PD + PD) * elt)),
    )(x_packed, ohp, w_blk, w_last, bias_p)

    return out_packed.reshape(B, L, D)


if __name__ == "__main__":
    # Small, deterministic shapes consistent with the module (chess board 8x8).
    board_shape = (8, 8)
    board_len = int(np.prod(board_shape))    # L = 64
    dim = 32
    batch = 2

    key = jax.random.PRNGKey(0)
    k1, k2, k3, k4 = jax.random.split(key, 4)

    tensors = jax.random.normal(k1, (batch, board_len, dim), dtype=jnp.float32)
    position = jax.random.randint(k2, (batch,), 0, board_len, dtype=jnp.int32)

    # Deterministic Linear(dim+1, dim) params (PyTorch-style uniform init).
    bound = 1.0 / np.sqrt(dim + 1)
    W = jax.random.uniform(k3, (dim, dim + 1), minval=-bound, maxval=bound,
                           dtype=jnp.float32)
    b = jax.random.uniform(k4, (dim,), minval=-bound, maxval=bound,
                           dtype=jnp.float32)

    # Weight prep hoisted out of the per-call path.
    params = prepare_possel_params(W, b)

    # Default heuristic at batch=2 gives TB=1 -> a 2-step grid, exercising the
    # tiled / pipelined path.
    out = position_selection(tensors, position, params)
    out = jax.block_until_ready(out)

    # Pure-JAX reference of the original forward (one_hot + concat + linear).
    oh_ref = jax.nn.one_hot(position, board_len, dtype=jnp.float32)
    oh_ref = oh_ref.reshape(batch, board_len, 1)
    x_cat = jnp.concatenate([tensors, oh_ref], axis=-1)           # (B, L, D+1)
    ref = jnp.einsum("bld,od->blo", x_cat, W) + b                 # (B, L, D)

    np.testing.assert_allclose(np.asarray(out), np.asarray(ref),
                               rtol=1e-5, atol=1e-5)
    print("KERNEL_OK")
</pallas_src>

<mosaic_0001>
module attributes {stable_mosaic.version = 11 : i64} {
  func.func @_possel_kernel(%arg0: i32, %arg1: memref<16x128xf32, #tpu.memory_space<vmem>>, %arg2: memref<16x8xbf16, #tpu.memory_space<vmem>>, %arg3: memref<128x128xf32, #tpu.memory_space<vmem>>, %arg4: memref<8x128xf32, #tpu.memory_space<vmem>>, %arg5: memref<1x128xf32, #tpu.memory_space<vmem>>, %arg6: memref<16x128xf32, #tpu.memory_space<vmem>>) attributes {dimension_semantics = [#tpu.dimension_semantics<parallel>], iteration_bounds = array<i64: 2>, scalar_prefetch = 0 : i64, scratch_operands = 0 : i64, tpu.core_type = #tpu.core_type<tc>, window_params = [{transform_indices = @transform_0, window_bounds = array<i64: 16, 128>}, {transform_indices = @transform_1, window_bounds = array<i64: 16, 8>}, {pipeline_mode = #tpu.pipeline_mode<synchronous>, transform_indices = @transform_2, window_bounds = array<i64: 128, 128>}, {pipeline_mode = #tpu.pipeline_mode<synchronous>, transform_indices = @transform_3, window_bounds = array<i64: 8, 128>}, {pipeline_mode = #tpu.pipeline_mode<synchronous>, transform_indices = @transform_4, window_bounds = array<i64: 1, 128>}, {transform_indices = @transform_5, window_bounds = array<i64: 16, 128>}]} {
    %c0 = arith.constant 0 : index
    %c0_0 = arith.constant 0 : index
    %0 = vector.load %arg1[%c0, %c0_0] : memref<16x128xf32, #tpu.memory_space<vmem>>, vector<16x128xf32>
    %c0_1 = arith.constant 0 : index
    %c0_2 = arith.constant 0 : index
    %1 = vector.load %arg3[%c0_1, %c0_2] : memref<128x128xf32, #tpu.memory_space<vmem>>, vector<128x128xf32>
    %cst = arith.constant dense<0.000000e+00> : vector<16x128xf32>
    %2 = tpu.matmul %0, %1, %cst {dimension_numbers = #tpu.dot_dimension_numbers<[1], [0], [0], [1], [0, 0, 1, 1], [], []>} : vector<16x128xf32>, vector<128x128xf32>, vector<16x128xf32> -> vector<16x128xf32>
    %c0_3 = arith.constant 0 : index
    %c0_4 = arith.constant 0 : index
    %3 = vector.load %arg2[%c0_3, %c0_4] : memref<16x8xbf16, #tpu.memory_space<vmem>>, vector<16x8xbf16>
    %4 = arith.extf %3 : vector<16x8xbf16> to vector<16x8xf32>
    %c0_5 = arith.constant 0 : index
    %c0_6 = arith.constant 0 : index
    %5 = vector.load %arg4[%c0_5, %c0_6] : memref<8x128xf32, #tpu.memory_space<vmem>>, vector<8x128xf32>
    %cst_7 = arith.constant dense<0.000000e+00> : vector<16x128xf32>
    %6 = tpu.matmul %4, %5, %cst_7 {dimension_numbers = #tpu.dot_dimension_numbers<[1], [0], [0], [1], [0, 0, 1, 1], [], []>} : vector<16x8xf32>, vector<8x128xf32>, vector<16x128xf32> -> vector<16x128xf32>
    %7 = arith.addf %2, %6 : vector<16x128xf32>
    %c0_8 = arith.constant 0 : index
    %c0_9 = arith.constant 0 : index
    %8 = vector.load %arg5[%c0_8, %c0_9] : memref<1x128xf32, #tpu.memory_space<vmem>>, vector<1x128xf32>
    %9 = vector.broadcast %8 : vector<1x128xf32> to vector<16x128xf32>
    %10 = arith.addf %7, %9 : vector<16x128xf32>
    %c0_10 = arith.constant 0 : index
    %c0_11 = arith.constant 0 : index
    %11 = vector.load %arg6[%c0_10, %c0_11] : memref<16x128xf32, #tpu.memory_space<vmem>>, vector<16x128xf32>
    tpu.vector_store %arg6[%c0_10, %c0_11], %10 {strides = array<i32>} : memref<16x128xf32, #tpu.memory_space<vmem>>, vector<16x128xf32>,
    return
  }
  func.func @transform_0(%arg0: i32) -> (i32, i32) {
    %c0_i32 = arith.constant 0 : i32
    %c0_i32_0 = arith.constant 0 : i32
    return %arg0, %c0_i32 : i32, i32
  }
  func.func @transform_1(%arg0: i32) -> (i32, i32) {
    %c0_i32 = arith.constant 0 : i32
    %c0_i32_0 = arith.constant 0 : i32
    return %arg0, %c0_i32 : i32, i32
  }
  func.func @transform_2(%arg0: i32) -> (i32, i32) {
    %c0_i32 = arith.constant 0 : i32
    %c0_i32_0 = arith.constant 0 : i32
    %c0_i32_1 = arith.constant 0 : i32
    return %c0_i32, %c0_i32_0 : i32, i32
  }
  func.func @transform_3(%arg0: i32) -> (i32, i32) {
    %c0_i32 = arith.constant 0 : i32
    %c0_i32_0 = arith.constant 0 : i32
    %c0_i32_1 = arith.constant 0 : i32
    return %c0_i32, %c0_i32_0 : i32, i32
  }
  func.func @transform_4(%arg0: i32) -> (i32, i32) {
    %c0_i32 = arith.constant 0 : i32
    %c0_i32_0 = arith.constant 0 : i32
    %c0_i32_1 = arith.constant 0 : i32
    return %c0_i32, %c0_i32_0 : i32, i32
  }
  func.func @transform_5(%arg0: i32) -> (i32, i32) {
    %c0_i32 = arith.constant 0 : i32
    %c0_i32_0 = arith.constant 0 : i32
    return %arg0, %c0_i32 : i32, i32
  }
}

</mosaic_0001>

<bundles_post_ra>
// kernel: tpu_custom_call.1
= control target key start
LH: loop header
LB: loop body
LE: loop exit
PB: predicated region body
PF: predicated region fallthrough
CT: control target
= control target key end

     0   :  { %10 = vsyncpa [#allocation3], 0  ;;  %s1157_s0 = inlined_call_operand.hbm [shape: f32[32,128], index: 0, kind: input, shape index: {}]   ;;  %s1158_s1 = inlined_call_operand.vmem [shape: bf16[32,8], index: 1, kind: input, shape index: {}]   ;;  %s1159_s2 = inlined_call_operand.hbm [shape: f32[128,128], index: 2, kind: input, shape index: {}]   ;;  %s1160_s3 = inlined_call_operand.vmem [shape: f32[8,128], index: 3, kind: input, shape index: {}]   ;;  %s1161_s4 = inlined_call_operand.vmem [shape: f32[1,128], index: 4, kind: input, shape index: {}]   ;;  %s1162_s5 = inlined_call_operand.hbm [shape: f32[32,128], index: 5, kind: output, shape index: {}]  }
   0x1   :  { %12 = vsyncpa [#allocation3 + $0x1], 0 }
   0x2   :  { %13 = vsyncpa [#allocation6], 0 }
   0x3   :  { %14 = vsyncpa [#allocation4], 0 }
   0x4   :  { %16 = vsyncpa [#allocation4 + $0x1], 0  ;;  %s932_s18 = smov 0   ;;  %s934_s19 = smov 0  }
   0x5   :  { %s936_s20 = smov 0   ;;  %s938_s21 = smov 0  }
   0x6 LB: > { %s953_s22 = sadd.s32 4294967295, %s893_s21   ;;  %s582_s23 = sadd.s32 4294967294, %s893_s21   ;;  %s893_s21 = sphi %s938_s21, %s1182_s21   ;;  %s889_s20 = sphi %s936_s20, %s1181_s20   ;;  %s885_s19 = sphi %s934_s19, %s1180_s19   ;;  %s881_s18 = sphi %s932_s18, %s1179_s18  }
   0x7   : > { %p42_p0 = scmp.ne.s32.totalorder %s885_s19, %s881_s18  ;;  %p1163_p1 = scmp.eq.s32.totalorder %s953_s22, 0 }
   0x8   : > { %p161_p3 = scmp.eq.s32.totalorder %s582_s23, 1  ;;  %p583_p5 = scmp.ge.s32.totalorder %s893_s21, 1 }
   0x9   : > { %p962_p4 = por %p1163_p1, %p42_p0  ;;  %p168_p7 = scmp.lt.s32.totalorder %s893_s21, 3 }
   0xa   : > { %p967_p6 = por %p161_p3, %p42_p0  ;;  %s895_s27 = smov [#allocation5]  }
   0xb   : > { %s1166_s24 = scalar_select %p962_p4, 1, 0 }
   0xc   : > { %s1167_s25 = scalar_select %p967_p6, 1, 0 }
   0xd   : > { %p972_p8 = pnand %p583_p5, %p168_p7  ;;  %s180_s28 = sshll.u32 %s895_s27, 4  ;;  %s976_s28 = int_to_ptr.vmem [resolvable:$true] %s180_s28 }
   0xe   : > { %s988_s30 = sadd.s32 1, %s893_s21   ;;  %s29_s6 = sadd.s32 1, %s889_s20 }
   0xf   : > { %s1168_s26 = scalar_select %p972_p8, 1, 0 }
  0x10   : > { %p712_p9 = pneg %p972_p8  ;;  %s26_s7 = ssub.s32 %s893_s21, %s988_s30 }
  0x11   : > { %s765_s10 = scalar_lea.hbm %s1159_s2, 2048 }
  0x12   : > { %p983_p11 = pnand %p712_p9, %p1163_p1  ;;  %p766_p12 = scmp.ne.s32.totalorder %s1159_s2, %s765_s10 }
  0x13   : > { %p772_p5 = scmp.lt.u32.totalorder %s765_s10, %s1159_s2 }
  0x14   : > { %p767_p13 = pneg %p983_p11 }
  0x16   : > { %p768_p0 = pnand %p767_p13, %p766_p12 }
  0x18   : > { %p769_p3 = pneg %p768_p0 }
  0x1a   : > { %p774_p7 = pnand %p772_p5, %p769_p3 }
  0x1c   : > { %777 = shalt.err (!%p774_p7)
}
  0x1d   : > { %s778_s15 = scalar_lea.vmem %s976_s28, 2048  ;;  %p786_p2 = scmp.lt.s32.totalorder %s976_s28, %s976_s28 }
  0x1e   : > { %p779_p9 = scmp.ne.s32.totalorder %s976_s28, %s778_s15  ;;  %p787_p6 = scmp.lt.s32.totalorder %s778_s15, %s778_s15 }
  0x20   : > { %p781_p10 = pnand %p779_p9, %p767_p13  ;;  %p788_p4 = por %p787_p6, %p786_p2 }
  0x22   : > { %p782_p1 = pneg %p781_p10 }
  0x24   : > { %p789_p8 = pnand %p788_p4, %p782_p1 }
  0x26   : > { %792 = shalt.err (!%p789_p8)
}
  0x27   : > { %s896_s16 = smov 128   ;;  %s897_s17 = smov 8  }
  0x28   : > { %715 = dma.hbm_to_vmem [thread:$0]  (!%p983_p11), %s1159_s2, 2048, %s976_s28, [#allocation6], %s896_s16, %s896_s16, %s897_s17  }
  0x29   : > { %p27_p1 = scmp.eq.s32.totalorder %s26_s7, 0  ;;  %p36_p2 = scmp.ne.s32.totalorder %s889_s20, %s885_s19 }
  0x2a   : > { %p37_p4 = scmp.eq.s32.totalorder %s893_s21, 0  ;;  %p725_p6 = scmp.lt.s32.totalorder %s893_s21, 2 }
  0x2b   : > { %s1022_s8 = scalar_select %p27_p1, %s889_s20, %s29_s6  }
  0x2c   : > { %p38_p8 = por %p37_p4, %p36_p2  ;;  %p1170_p10 = scmp.eq.s32.totalorder %s953_s22, 1 }
  0x2d   : > { %s200_s29 = sand.u32 1, %s889_s20   ;;  %s603_s10 = sshll.u32 %s893_s21, 8 }
  0x2e   : > { %p1026_p12 = por %p1170_p10, %p36_p2  ;;  %s586_s11 = sshll.u32 %s200_s29, 4 }
  0x2f   : > { %s1035_s14 = scalar_lea.hbm %s1157_s0, %s603_s10  ;;  %s204_s28 = scalar_lea.vmem [#allocation2], %s586_s11 }
  0x30   : > { %s211_s6 = sshll.u32 %s204_s28, 4  ;;  %p1037_p11 = pnand %p725_p6, %p38_p8  ;;  %s1041_s6 = int_to_ptr.vmem [resolvable:$true] %s211_s6 }
  0x31   : > { %s1043_s15 = scalar_lea.sflag [#allocation3], %s200_s29  ;;  %s793_s23 = scalar_lea.hbm %s1035_s14, 256 }
  0x32   : > { %p794_p13 = scmp.ne.s32.totalorder %s1035_s14, %s793_s23  ;;  %p795_p0 = pneg %p1037_p11 }
  0x33   : > { %s798_s11 = scalar_lea.hbm %s1157_s0, 512  ;;  %p799_p7 = scmp.lt.u32.totalorder %s1035_s14, %s1157_s0 }
  0x34   : > { %p796_p3 = pnand %p795_p0, %p794_p13  ;;  %p800_p9 = scmp.lt.u32.totalorder %s798_s11, %s793_s23 }
  0x35   : > { %p802_p2 = scmp.lt.u32.totalorder %s793_s23, %s1035_s14 }
  0x36   : > { %p797_p5 = pneg %p796_p3  ;;  %p801_p1 = por %p800_p9, %p799_p7 }
  0x38   : > { %p803_p4 = por %p802_p2, %p801_p1 }
  0x3a   : > { %p804_p6 = pnand %p803_p4, %p797_p5 }
  0x3c   : > { %807 = shalt.err (!%p804_p6)
}
  0x3d   : > { %s808_s29 = scalar_lea.vmem %s1041_s6, 256  ;;  %s898_s28 = smov [#allocation2]  }
  0x3e   : > { %p809_p8 = scmp.ne.s32.totalorder %s1041_s6, %s808_s29  ;;  %s813_s27 = sshll.u32 %s898_s28, 4  ;;  %s814_s27 = int_to_ptr.vmem [resolvable:$false] %s813_s27 }
  0x3f   : > { %s815_s10 = scalar_lea.vmem %s814_s27, 512  ;;  %p816_p3 = scmp.lt.s32.totalorder %s1041_s6, %s814_s27 }
  0x40   : > { %p811_p10 = pnand %p809_p8, %p795_p0  ;;  %p817_p7 = scmp.lt.s32.totalorder %s815_s10, %s808_s29 }
  0x42   : > { %p812_p13 = pneg %p811_p10  ;;  %p818_p9 = por %p817_p7, %p816_p3 }
  0x44   : > { %p819_p1 = pnand %p818_p9, %p812_p13 }
  0x46   : > { %822 = shalt.err (!%p819_p1)
}
  0x47   : > { %719 = dma.hbm_to_vmem [thread:$0]  (!%p1037_p11), %s1035_s14, 256, %s1041_s6, %s1043_s15, %s896_s16, %s896_s16, %s897_s17  }
  0x48   : > { %p1173_p0 = scmp.ne.s32.totalorder %s1168_s26, 0 }
  0x49   : > { %s1077_s23 = sand.u32 (!%p1173_p0), 1, %s885_s19   ;;  %p1174_p5 = scmp.ne.s32.totalorder (!%p1173_p0), %s1166_s24, 0 }
  0x4a   : > { %232 = sbr.rel (%p1173_p0) target bundleno = 352 (0x160), region = 40  ;;  %s590_s11 = sshll.u32 (!%p1173_p0), %s1077_s23, 4 }
  0x4b   : > { %s235_s12 = scalar_lea.sflag (!%p1173_p0), [#allocation3], %s1077_s23  ;;  %s1083_s7 = scalar_lea.vmem (!%p1173_p0), [#allocation2], %s590_s11 }
  0x51   : > { %868 = dma.done.wait (%p1174_p5), %s235_s12, 256  }
  0x52   : > { %870 = vsyncadd (%p1174_p5), %s235_s12, 4294967040  ;;  %p1175_p11 = scmp.eq.s32.totalorder %s953_s22, 0 }
  0x54   : > { %872 = dma.done.wait (%p1175_p11), [#allocation6], 2048   ;;  %p1176_p2 = pmov %p1175_p11 }
  0x55   : > { %s593_s26 = sshll.u32 %s953_s22, 1  ;;  %v284_v0 = vld [vmem:[#allocation5] sm:$0xff]  ;;  %v285_v1 = vld [vmem:[#allocation5 + $0x8] sm:$0xff]  ;;  %v286_v2 = vld [vmem:[#allocation5 + $0x10] sm:$0xff]  ;;  %vm305_vm0 = vcmask 64512   ;;  %s273_s13 = scalar_lea.vmem [#allocation7], %s590_s11 }
  0x56   : > { %874 = vsyncadd (%p1176_p2), [#allocation6], 4294965248  ;;  %p276_p4 = scmp.lt.s32.totalorder %s593_s26, 3  ;;  %v670_v3 = vpack.c.bf16 %v285_v1, %v284_v0  ;;  %v287_v4 = vld [vmem:[#allocation5 + $0x18] sm:$0xff]  ;;  %v288_v6 = vld [vmem:[#allocation5 + $0x20] sm:$0xff]  ;;  %s487_s29 = sshll.u32 %s273_s13, 4  ;;  %s1108_s29 = int_to_ptr.vmem [resolvable:$true] %s487_s29 }
  0x57   : > { %v674_v5 = vpack.c.bf16 %v287_v4, %v286_v2  ;;  %v289_v7 = vld [vmem:[#allocation5 + $0x28] sm:$0xff]  ;;  %v304_v9 = vld [vmem:[%s1160_s3] sm:$0xff]  ;;  %v290_v11 = vld [vmem:[#allocation5 + $0x30] sm:$0xff]  ;;  %s604_s10 = sshll.u32 %s953_s22, 8  ;;  %s899_s22 = smov [#allocation7]  }
  0x58   : > { %s1184_s26 = smov (!%p276_p4, %s593_s26), 3  ;;  %671 = vmatprep.subr.bf16.mxu0 %v670_v3  ;;  %v678_v8 = vpack.c.bf16 %v289_v7, %v288_v6  ;;  %v291_v12 = vld [vmem:[#allocation5 + $0x38] sm:$0xff]  ;;  %630 = vmatprep.subr.mxu1 %v304_v9  ;;  %v282_v15 = vld [vmem:[%s1083_s7] sm:$0xff]  ;;  %v293_v18 = vld [vmem:[#allocation5 + $0x48] sm:$0xff]  ;;  %s1113_s11 = scalar_lea.hbm %s1162_s5, %s604_s10 }
  0x59   : > { %s594_s16 = sshll.u32 %s1184_s26, 2  ;;  %673 = vmatpush3.bf16.msra.mxu0 %v670_v3  ;;  %631 = vmatpush3.msra.mxu1 %v304_v9  ;;  %v682_v16 = vpack.c.bf16 %v291_v12, %v290_v11  ;;  %v292_v17 = vld [vmem:[#allocation5 + $0x40] sm:$0xff]  ;;  %v294_v20 = vld [vmem:[#allocation5 + $0x50] sm:$0xff]  ;;  %v295_v21 = vld [vmem:[#allocation5 + $0x58] sm:$0xff]  ;;  %s474_s26 = scalar_lea.sflag [#allocation4], %s1077_s23 }
  0x5a   : > { %s279_s14 = scalar_lea.vmem %s1158_s1, %s594_s16  ;;  %675 = vmatprep.subr.bf16.mxu0 %v674_v5  ;;  %667 = vmatprep.mubr.f32.mxu0 %v282_v15  ;;  %v686_v19 = vpack.c.bf16 %v293_v18, %v292_v17  ;;  %v690_v22 = vpack.c.bf16 %v295_v21, %v294_v20  ;;  %v296_v23 = vld [vmem:[#allocation5 + $0x60] sm:$0xff]  ;;  %v297_v24 = vld [vmem:[#allocation5 + $0x68] sm:$0xff]  ;;  %v298_v26 = vld [vmem:[#allocation5 + $0x70] sm:$0xff]  ;;  %s823_s16 = scalar_lea.vmem %s1108_s29, 256 }
  0x5b   : > { %v606_v10 = vld [vmem:[%s279_s14] sm:$0xff]   ;;  %v694_v25 = vpack.c.bf16 %v297_v24, %v296_v23  ;;  %v299_v27 = vld [vmem:[#allocation5 + $0x78] sm:$0xff]  ;;  %p824_p6 = scmp.ne.s32.totalorder %s1108_s29, %s823_s16  ;;  %s827_s24 = sshll.u32 %s899_s22, 4  ;;  %s828_s24 = int_to_ptr.vmem [resolvable:$false] %s827_s24 }
  0x5c   : > { %v607_v13 = vunpack.c.l.bf16 %v606_v10  ;;  %v608_v14 = vunpack.c.h.bf16 %v606_v10  ;;  %v698_v28 = vpack.c.bf16 %v299_v27, %v298_v26  ;;  %v283_v29 = vld [vmem:[%s1083_s7 + $0x8] sm:$0xff]  ;;  %v597_v33 = vld [vmem:[%s1161_s4] ss:$0 sm:$0xff]  ;;  %s829_s17 = scalar_lea.vmem %s828_s24, 512  ;;  %p830_p13 = scmp.lt.s32.totalorder %s1108_s29, %s828_s24 }
  0x5d   : > { %677 = vmatpush3.bf16.msra.mxu0 %v674_v5  ;;  %p825_p8 = pnand %p824_p6, %p1026_p12  ;;  %p831_p3 = scmp.lt.s32.totalorder %s829_s17, %s823_s16 }
  0x5e   : > { %632 = vmatprep.mubr.msk.f32.mxu1 %vm305_vm0, %v607_v13  ;;  %679 = vmatprep.subr.bf16.mxu0 %v678_v8 }
  0x5f   : > { %633 = vmatmul.mubr.msk.f32.vlgmr.msra.gmra.mrb[0].mxu1 %vm305_vm0, %v608_v14  ;;  %p826_p10 = pneg %p825_p8  ;;  %p832_p7 = por %p831_p3, %p830_p13 }
  0x61   : > { %681 = vmatpush3.bf16.msra.mxu0 %v678_v8  ;;  %p833_p9 = pnand %p832_p7, %p826_p10 }
  0x62   : > { %683 = vmatprep.subr.bf16.mxu0 %v682_v16 }
  0x65   : > { %685 = vmatpush3.bf16.msra.mxu0 %v682_v16 }
  0x66   : > { %687 = vmatprep.subr.bf16.mxu0 %v686_v19 }
  0x69   : > { %689 = vmatpush3.bf16.msra.mxu0 %v686_v19 }
  0x6a   : > { %691 = vmatprep.subr.bf16.mxu0 %v690_v22 }
  0x6d   : > { %693 = vmatpush3.bf16.msra.mxu0 %v690_v22 }
  0x6e   : > { %695 = vmatprep.subr.bf16.mxu0 %v694_v25 }
  0x71   : > { %697 = vmatpush3.bf16.msra.mxu0 %v694_v25 }
  0x72   : > { %699 = vmatprep.subr.bf16.mxu0 %v698_v28 }
  0x75   : > { %701 = vmatpush3.bf16.msra.mxu0 %v698_v28 }
  0x78   : > { %668 = vmatmul.mubr.f32.vlgmr.msra.gmra.mrb[0].mxu0 %v283_v29 }
 0x132   : > { %v634_v30 = vpop.f32.mrb[0].mxu1 }
 0x133   : > { %v378_v31 = vpop.f32.mrb[1].mxu1 }
 0x14b   : > { %v669_v32 = vpop.f32.mrb[0].mxu0 }
 0x14c   : > { %v459_v34 = vadd.f32 %v669_v32, %v634_v30  ;;  %v453_v35 = vpop.f32.mrb[1].mxu0 }
 0x14d   : > { %v454_v36 = vadd.f32 %v453_v35, %v378_v31 }
 0x14e   : > { %v470_v37 = vadd.f32 %v597_v33, %v459_v34 }
 0x14f   : > { %v469_v38 = vadd.f32 %v597_v33, %v454_v36 }
 0x150   : > { %472 = vst [vmem:[%s273_s13 + $0x8] sm:$0xff] %v470_v37 }
 0x151   : > { %471 = vst [vmem:[%s273_s13] sm:$0xff] %v469_v38 }
 0x152   : > { %836 = shalt.err (!%p833_p9)
}
 0x153   : > { %s837_s14 = scalar_lea.hbm %s1113_s11, 256  ;;  %s841_s13 = scalar_lea.hbm %s1162_s5, 512 }
 0x154   : > { %p838_p1 = scmp.ne.s32.totalorder %s1113_s11, %s837_s14  ;;  %p842_p11 = scmp.lt.u32.totalorder %s1113_s11, %s1162_s5 }
 0x155   : > { %p843_p2 = scmp.lt.u32.totalorder %s841_s13, %s837_s14  ;;  %p845_p6 = scmp.lt.u32.totalorder %s837_s14, %s1113_s11 }
 0x156   : > { %p839_p0 = pnand %p838_p1, %p1026_p12 }
 0x157   : > { %p844_p4 = por %p843_p2, %p842_p11 }
 0x158   : > { %p840_p5 = pneg %p839_p0 }
 0x159   : > { %p846_p8 = por %p845_p6, %p844_p4 }
 0x15b   : > { %p847_p10 = pnand %p846_p8, %p840_p5 }
 0x15d   : > { %850 = shalt.err (!%p847_p10)
}
 0x15e   : > { %s900_s10 = smov 128   ;;  %s901_s12 = smov 8  }
 0x15f   : > { %710 = dma.vmem_to_hbm [thread:$0]  (%p1026_p12), %s1108_s29, 256, %s1113_s11, %s474_s26, %s900_s10, %s900_s10, %s901_s12  }
 0x160 PF: > { %s502_s7 = sand.u32 1, %s881_s18   ;;  %p1177_p13 = scmp.ne.s32.totalorder %s1167_s25, 0 }
 0x161   : > { %p1178_p3 = scmp.ge.s32.totalorder %s893_s21, 2  ;;  %s503_s16 = scalar_lea.sflag [#allocation4], %s502_s7 }
 0x163   : > { %p721_p7 = pnand %p1178_p3, %p1177_p13 }
 0x165   : > { %876 = dma.done.wait (!%p721_p7), %s503_s16, 256  }
 0x166   : > { %878 = vsyncadd (!%p721_p7), %s503_s16, 4294967040  ;;  %p19_p9 = scmp.ge.s32.totalorder %s988_s30, 4   ;;  %s1179_s18 = smov %s885_s19 }
 0x167   : > { %s1180_s19 = smov %s889_s20  ;;  %s1181_s20 = smov %s1022_s8 }
 0x168   : > { %s1182_s21 = smov %s988_s30  ;;  %21 = sbr.rel (!%p19_p9) target bundleno = 6 (0x6), region = 92 }
 0x16f   :  { %508 = vsyncpa [#allocation3], 1 }
 0x170   :  { %510 = vsyncpa [#allocation3 + $0x1], 1 }
 0x171   :  { %511 = vsyncpa [#allocation6], 1 }
 0x172   :  { %512 = vsyncpa [#allocation4], 1 }
 0x173   :  { %514 = vsyncpa [#allocation4 + $0x1], 1 }

</bundles_post_ra>
